<compile_context>
chip_gen: v6e
topology: v6e:2x2x1
jax: 0.10.0
libtpu: 0.0.40
codegen_flags: <defaults>
</compile_context>

<pallas_src>
import functools

import jax
import jax.numpy as jnp
from jax.experimental import pallas as pl
from jax.experimental.pallas import tpu as pltpu

_LANE = 128


def _round_up(x, m):
    return ((x + m - 1) // m) * m


def _vmem_tuning():
    """Per-generation (per-step input byte budget, vmem_limit_bytes)."""
    try:
        vmem_phys = int(getattr(pltpu.get_tpu_info(), "vmem_capacity_bytes", 0))
    except Exception:
        vmem_phys = 0
    if vmem_phys >= 96 * 1024 * 1024:
        # v5e / v6e: 128 MiB physical VMEM -> bigger tiles, higher scoped limit.
        return 12 * 1024 * 1024, 64 * 1024 * 1024
    # v7x (64 MiB physical VMEM) or unknown chip: stay conservative.
    return 8 * 1024 * 1024, 40 * 1024 * 1024


def _combined_loss_kernel(p_ref, t_ref, o_ref, *, smooth, batch, batch_block):
    """One grid step = one (batch_block, tsteps) tile; grid axis is parallel.

    Writes [bce_sum, dice_score_sum, 0, ...] for this block to a lane-dense
    (1, 128) partial-output row.  No cross-step carry / scratch.
    """
    i = pl.program_id(0)

    x = p_ref[...].astype(jnp.float32)
    t = t_ref[...].astype(jnp.float32)

    # Shared transcendentals: one exp + one (approx) reciprocal + one log.
    e = jnp.exp(-jnp.abs(x))                        # exp(-|x|) in (0, 1]
    r = pl.reciprocal(1.0 + e, approx=True)         # 1 / (1 + exp(-|x|))
    s = jnp.where(x >= 0.0, r, e * r)               # sigmoid(x)

    # Numerically stable BCE-with-logits (matches torch.nn.BCEWithLogitsLoss):
    #   max(x, 0) - x*t + log(1 + exp(-|x|))
    # (jnp.log(1+e) instead of log1p: abs error <= ~e^2/2, negligible here.)
    bce = jnp.maximum(x, 0.0) - x * t + jnp.log(1.0 + e)

    # Per-row reductions over the full time axis (exact per-row dice).
    bce_row = jnp.sum(bce, axis=1, keepdims=True)                # (BB, 1)
    inter = jnp.sum(s * t, axis=1, keepdims=True)                # (BB, 1)
    union = jnp.sum(s + t, axis=1, keepdims=True)                # (BB, 1)
    dice_row = (2.0 * inter + smooth) / (union + smooth)         # (BB, 1)

    # Ragged batch edge: rows past `batch` in the last (partial) block contain
    # undefined VMEM data -> select them out (jnp.where also drops any NaNs
    # produced from that garbage, since the false-branch value is used).
    row = i * batch_block + jax.lax.broadcasted_iota(
        jnp.int32, (batch_block, 1), 0)
    valid = row < batch
    bce_sum = jnp.sum(jnp.where(valid, bce_row, 0.0))
    dice_sum = jnp.sum(jnp.where(valid, dice_row, 0.0))

    lane = jax.lax.broadcasted_iota(jnp.int32, o_ref.shape, 1)
    o_ref[...] = jnp.where(lane == 0, bce_sum,
                           jnp.where(lane == 1, dice_sum, 0.0))


def combined_bce_dice_loss(preds, targets, *, alpha=0.5, smooth=1.0,
                           batch_block=None):
    """preds, targets: (batch, time_step) arrays. Returns a scalar f32 loss."""
    batch, tsteps = preds.shape
    assert targets.shape == preds.shape

    # HBM-bound kernel: labels are exactly {0, 1}, so a bf16 cast is lossless
    # and halves target bytes (f32 inputs: ~25% total HBM byte reduction).
    if jnp.issubdtype(targets.dtype, jnp.floating) and targets.dtype.itemsize > 2:
        targets = targets.astype(jnp.bfloat16)

    tile_budget, vmem_limit = _vmem_tuning()

    # Tile sizing: byte-capped only (no hard row cap).  Estimate with the
    # lane-padded time extent; 2 pipeline buffers of (preds + targets) tiles
    # stay well inside the requested vmem limit.
    if batch_block is None:
        tp = _round_up(tsteps, _LANE)
        row_bytes = tp * (preds.dtype.itemsize + targets.dtype.itemsize)
        batch_block = max(8, tile_budget // max(row_bytes, 1))
    if batch_block >= batch:
        batch_block = batch                         # one block == full batch dim
    else:
        batch_block = max(8, (batch_block // 8) * 8)
    n_blocks = pl.cdiv(batch, batch_block)

    kernel = functools.partial(_combined_loss_kernel, smooth=float(smooth),
                               batch=batch, batch_block=batch_block)

    partials = pl.pallas_call(
        kernel,
        out_shape=jax.ShapeDtypeStruct((n_blocks, _LANE), jnp.float32),
        grid_spec=pltpu.PrefetchScalarGridSpec(
            num_scalar_prefetch=0,
            grid=(n_blocks,),
            in_specs=[
                pl.BlockSpec((batch_block, tsteps), lambda i: (i, 0)),
                pl.BlockSpec((batch_block, tsteps), lambda i: (i, 0)),
            ],
            out_specs=pl.BlockSpec((1, _LANE), lambda i: (i, 0)),
        ),
        compiler_params=pltpu.CompilerParams(
            dimension_semantics=("parallel",),
            vmem_limit_bytes=vmem_limit),
    )(preds, targets)

    bce_sum = jnp.sum(partials[:, 0])
    dice_sum = jnp.sum(partials[:, 1])
    bce_loss = bce_sum / jnp.float32(batch * tsteps)
    dice_loss = 1.0 - dice_sum / jnp.float32(batch)
    return alpha * bce_loss + (1.0 - alpha) * dice_loss


def _reference(preds, targets, alpha=0.5, smooth=1.0):
    x = preds.astype(jnp.float32)
    t = targets.astype(jnp.float32)
    bce = jnp.mean(jnp.maximum(x, 0.0) - x * t + jnp.log1p(jnp.exp(-jnp.abs(x))))
    s = jax.nn.sigmoid(x)
    inter = jnp.sum(s * t, axis=1)
    union = jnp.sum(s, axis=1) + jnp.sum(t, axis=1)
    dice = (2.0 * inter + smooth) / (union + smooth)
    return alpha * bce + (1.0 - alpha) * (1.0 - jnp.mean(dice))


if __name__ == "__main__":
    key = jax.random.PRNGKey(0)
    k_p, k_t, k_p2, k_t2 = jax.random.split(key, 4)
    # Tolerance covers the approx-reciprocal sigmoid (EUP vrcp, no refinement).
    TOL = 2e-3

    # Test 1: aligned shapes, f32 (matches the module's (batch, time_step)).
    batch, tsteps = 16, 128
    preds = jax.random.normal(k_p, (batch, tsteps), dtype=jnp.float32)
    targets = jax.random.bernoulli(k_t, 0.5, (batch, tsteps)).astype(jnp.float32)
    loss = jax.block_until_ready(
        combined_bce_dice_loss(preds, targets, alpha=0.5, smooth=1.0))
    ref = _reference(preds, targets, alpha=0.5, smooth=1.0)
    assert jnp.allclose(loss, ref, atol=TOL, rtol=TOL), (loss, ref)

    # Test 2: unaligned shapes + bf16 preds (non-128 time dim, dtype cast),
    # single full-batch block.
    batch2, tsteps2 = 13, 200
    preds2 = jax.random.normal(k_p2, (batch2, tsteps2),
                               dtype=jnp.float32).astype(jnp.bfloat16)
    targets2 = jax.random.bernoulli(
        k_t2, 0.5, (batch2, tsteps2)).astype(jnp.float32)
    loss2 = jax.block_until_ready(
        combined_bce_dice_loss(preds2, targets2, alpha=0.5, smooth=1.0))
    ref2 = _reference(preds2.astype(jnp.float32), targets2,
                      alpha=0.5, smooth=1.0)
    assert jnp.allclose(loss2, ref2, atol=TOL, rtol=TOL), (loss2, ref2)

    # Test 3: forced small batch_block -> multiple grid steps with a partial
    # last block (exercises the in-kernel row-validity mask).
    loss3 = jax.block_until_ready(
        combined_bce_dice_loss(preds2, targets2, alpha=0.5, smooth=1.0,
                               batch_block=8))
    assert jnp.allclose(loss3, ref2, atol=TOL, rtol=TOL), (loss3, ref2)

    print("KERNEL_OK")
</pallas_src>

<mosaic_0001>
module attributes {stable_mosaic.version = 11 : i64} {
  func.func @_combined_loss_kernel(%arg0: i32, %arg1: memref<16x128xf32, #tpu.memory_space<vmem>>, %arg2: memref<16x128xbf16, #tpu.memory_space<vmem>>, %arg3: memref<1x128xf32, #tpu.memory_space<vmem>>) attributes {dimension_semantics = [#tpu.dimension_semantics<parallel>], iteration_bounds = array<i64: 1>, scalar_prefetch = 0 : i64, scratch_operands = 0 : i64, tpu.core_type = #tpu.core_type<tc>, window_params = [{transform_indices = @transform_0, window_bounds = array<i64: 16, 128>}, {transform_indices = @transform_1, window_bounds = array<i64: 16, 128>}, {transform_indices = @transform_2, window_bounds = array<i64: 1, 128>}]} {
    %c0 = arith.constant 0 : index
    %c0_0 = arith.constant 0 : index
    %0 = vector.load %arg1[%c0, %c0_0] : memref<16x128xf32, #tpu.memory_space<vmem>>, vector<16x128xf32>
    %c0_1 = arith.constant 0 : index
    %c0_2 = arith.constant 0 : index
    %1 = vector.load %arg2[%c0_1, %c0_2] : memref<16x128xbf16, #tpu.memory_space<vmem>>, vector<16x128xbf16>
    %2 = arith.extf %1 : vector<16x128xbf16> to vector<16x128xf32>
    %3 = math.absf %0 : vector<16x128xf32>
    %cst = arith.constant 0.000000e+00 : f32
    %4 = vector.broadcast %cst : f32 to vector<16x128xf32>
    %5 = arith.subf %4, %3 : vector<16x128xf32>
    %6 = math.exp %5 : vector<16x128xf32>
    %cst_3 = arith.constant 1.000000e+00 : f32
    %7 = vector.broadcast %cst_3 : f32 to vector<16x128xf32>
    %8 = arith.addf %7, %6 : vector<16x128xf32>
    %9 = tpu.reciprocal %8 {approx = true} : vector<16x128xf32> -> vector<16x128xf32>
    %cst_4 = arith.constant 0.000000e+00 : f32
    %10 = vector.broadcast %cst_4 : f32 to vector<16x128xf32>
    %11 = arith.cmpf oge, %0, %10 : vector<16x128xf32>
    %12 = arith.mulf %6, %9 : vector<16x128xf32>
    %13 = arith.select %11, %9, %12 : vector<16x128xi1>, vector<16x128xf32>
    %cst_5 = arith.constant 0.000000e+00 : f32
    %14 = vector.broadcast %cst_5 : f32 to vector<16x128xf32>
    %15 = arith.maximumf %0, %14 : vector<16x128xf32>
    %16 = arith.mulf %0, %2 : vector<16x128xf32>
    %17 = arith.subf %15, %16 : vector<16x128xf32>
    %cst_6 = arith.constant 1.000000e+00 : f32
    %18 = vector.broadcast %cst_6 : f32 to vector<16x128xf32>
    %19 = arith.addf %18, %6 : vector<16x128xf32>
    %20 = math.log %19 : vector<16x128xf32>
    %21 = arith.addf %17, %20 : vector<16x128xf32>
    %cst_7 = arith.constant dense<0.000000e+00> : vector<16xf32>
    %22 = vector.multi_reduction <add>, %21, %cst_7 [1] : vector<16x128xf32> to vector<16xf32>
    %23 = vector.shape_cast %22 : vector<16xf32> to vector<16x1xf32>
    %24 = arith.mulf %13, %2 : vector<16x128xf32>
    %cst_8 = arith.constant dense<0.000000e+00> : vector<16xf32>
    %25 = vector.multi_reduction <add>, %24, %cst_8 [1] : vector<16x128xf32> to vector<16xf32>
    %26 = vector.shape_cast %25 : vector<16xf32> to vector<16x1xf32>
    %27 = arith.addf %13, %2 : vector<16x128xf32>
    %cst_9 = arith.constant dense<0.000000e+00> : vector<16xf32>
    %28 = vector.multi_reduction <add>, %27, %cst_9 [1] : vector<16x128xf32> to vector<16xf32>
    %29 = vector.shape_cast %28 : vector<16xf32> to vector<16x1xf32>
    %cst_10 = arith.constant 2.000000e+00 : f32
    %30 = vector.broadcast %cst_10 : f32 to vector<16x1xf32>
    %31 = arith.mulf %30, %26 : vector<16x1xf32>
    %cst_11 = arith.constant 1.000000e+00 : f32
    %32 = vector.broadcast %cst_11 : f32 to vector<16x1xf32>
    %33 = arith.addf %31, %32 : vector<16x1xf32>
    %cst_12 = arith.constant 1.000000e+00 : f32
    %34 = vector.broadcast %cst_12 : f32 to vector<16x1xf32>
    %35 = arith.addf %29, %34 : vector<16x1xf32>
    %36 = arith.divf %33, %35 : vector<16x1xf32>
    %c16_i32 = arith.constant 16 : i32
    %37 = arith.muli %arg0, %c16_i32 : i32
    %38 = tpu.iota {dimensions = array<i32: 0>} : vector<16x1xi32>
    %39 = vector.broadcast %37 : i32 to vector<16x1xi32>
    %40 = arith.addi %39, %38 : vector<16x1xi32>
    %c16_i32_13 = arith.constant 16 : i32
    %41 = vector.broadcast %c16_i32_13 : i32 to vector<16x1xi32>
    %42 = arith.cmpi slt, %40, %41 : vector<16x1xi32>
    %cst_14 = arith.constant 0.000000e+00 : f32
    %43 = vector.broadcast %cst_14 : f32 to vector<16x1xf32>
    %44 = arith.select %42, %23, %43 : vector<16x1xi1>, vector<16x1xf32>
    %45 = vector.shape_cast %44 : vector<16x1xf32> to vector<1x16x1xf32>
    %cst_15 = arith.constant dense<0.000000e+00> : vector<1xf32>
    %46 = vector.multi_reduction <add>, %45, %cst_15 [1, 2] : vector<1x16x1xf32> to vector<1xf32>
    %47 = vector.shape_cast %46 : vector<1xf32> to vector<1x1x1xf32>
    %48 = vector.extract %47[0, 0, 0] : f32 from vector<1x1x1xf32>
    %cst_16 = arith.constant 0.000000e+00 : f32
    %49 = vector.broadcast %cst_16 : f32 to vector<16x1xf32>
    %50 = arith.select %42, %36, %49 : vector<16x1xi1>, vector<16x1xf32>
    %51 = vector.shape_cast %50 : vector<16x1xf32> to vector<1x16x1xf32>
    %cst_17 = arith.constant dense<0.000000e+00> : vector<1xf32>
    %52 = vector.multi_reduction <add>, %51, %cst_17 [1, 2] : vector<1x16x1xf32> to vector<1xf32>
    %53 = vector.shape_cast %52 : vector<1xf32> to vector<1x1x1xf32>
    %54 = vector.extract %53[0, 0, 0] : f32 from vector<1x1x1xf32>
    %55 = tpu.iota {dimensions = array<i32: 1>} : vector<1x128xi32>
    %c0_i32 = arith.constant 0 : i32
    %56 = vector.broadcast %c0_i32 : i32 to vector<1x128xi32>
    %57 = arith.cmpi eq, %55, %56 : vector<1x128xi32>
    %c1_i32 = arith.constant 1 : i32
    %58 = vector.broadcast %c1_i32 : i32 to vector<1x128xi32>
    %59 = arith.cmpi eq, %55, %58 : vector<1x128xi32>
    %cst_18 = arith.constant 0.000000e+00 : f32
    %60 = vector.broadcast %54 : f32 to vector<1x128xf32>
    %61 = vector.broadcast %cst_18 : f32 to vector<1x128xf32>
    %62 = arith.select %59, %60, %61 : vector<1x128xi1>, vector<1x128xf32>
    %63 = vector.broadcast %48 : f32 to vector<1x128xf32>
    %64 = arith.select %57, %63, %62 : vector<1x128xi1>, vector<1x128xf32>
    %c0_19 = arith.constant 0 : index
    %c0_20 = arith.constant 0 : index
    %65 = vector.load %arg3[%c0_19, %c0_20] : memref<1x128xf32, #tpu.memory_space<vmem>>, vector<1x128xf32>
    tpu.vector_store %arg3[%c0_19, %c0_20], %64 {strides = array<i32>} : memref<1x128xf32, #tpu.memory_space<vmem>>, vector<1x128xf32>,
    return
  }
  func.func @transform_0(%arg0: i32) -> (i32, i32) {
    %c0_i32 = arith.constant 0 : i32
    %c0_i32_0 = arith.constant 0 : i32
    return %arg0, %c0_i32 : i32, i32
  }
  func.func @transform_1(%arg0: i32) -> (i32, i32) {
    %c0_i32 = arith.constant 0 : i32
    %c0_i32_0 = arith.constant 0 : i32
    return %arg0, %c0_i32 : i32, i32
  }
  func.func @transform_2(%arg0: i32) -> (i32, i32) {
    %c0_i32 = arith.constant 0 : i32
    %c0_i32_0 = arith.constant 0 : i32
    return %arg0, %c0_i32 : i32, i32
  }
}

</mosaic_0001>

<bundles_post_ra>
// kernel: tpu_custom_call.1
= control target key start
LH: loop header
LB: loop body
LE: loop exit
PB: predicated region body
PF: predicated region fallthrough
CT: control target
= control target key end

     0   :  { %7 = vsyncpa [#allocation3], 0  ;;  %s297_s0 = inlined_call_operand.hbm [shape: f32[16,128], index: 0, kind: input, shape index: {}]   ;;  %s298_s1 = inlined_call_operand.hbm [shape: bf16[16,128], index: 1, kind: input, shape index: {}]   ;;  %s299_s2 = inlined_call_operand.hbm [shape: f32[1,128], index: 2, kind: output, shape index: {}]  }
   0x1   :  { %8 = vsyncpa [#allocation6], 0 }
   0x2   :  { %9 = vsyncpa [#allocation4], 0  ;;  %s262_s9 = smov [#allocation2]  }
   0x3   :  { %s15_s10 = sshll.u32 %s262_s9, 4  ;;  %s16_s10 = int_to_ptr.vmem [resolvable:$true] %s15_s10 }
   0x4   :  { %s204_s11 = scalar_lea.vmem %s16_s10, 256  ;;  %p209_p1 = scmp.lt.s32.totalorder %s16_s10, %s16_s10 }
   0x5   :  { %p205_p0 = scmp.ne.s32.totalorder %s16_s10, %s204_s11  ;;  %p210_p2 = scmp.lt.s32.totalorder %s204_s11, %s204_s11 }
   0x7   :  { %p211_p3 = por %p210_p2, %p209_p1 }
   0x9   :  { %p212_p4 = pnand %p211_p3, %p205_p0 }
   0xb   :  { %215 = shalt.err (!%p212_p4)
}
   0xc   :  { %s263_s12 = smov 128   ;;  %s264_s13 = smov 8  }
   0xd   :  { %21 = dma.hbm_to_vmem [thread:$0]  %s297_s0, 256, %s16_s10, [#allocation3], %s263_s12, %s263_s12, %s264_s13  }
   0xe   :  { %s265_s16 = smov [#allocation5]  }
   0xf   :  { %s27_s17 = sshll.u32 %s265_s16, 4  ;;  %s28_s17 = int_to_ptr.vmem [resolvable:$true] %s27_s17 }
  0x10   :  { %s224_s18 = scalar_lea.vmem %s28_s17, 128  ;;  %p229_p6 = scmp.lt.s32.totalorder %s28_s17, %s28_s17 }
  0x11   :  { %p225_p5 = scmp.ne.s32.totalorder %s28_s17, %s224_s18  ;;  %p230_p7 = scmp.lt.s32.totalorder %s224_s18, %s224_s18 }
  0x13   :  { %p231_p8 = por %p230_p7, %p229_p6 }
  0x15   :  { %p232_p9 = pnand %p231_p8, %p225_p5 }
  0x17   :  { %235 = shalt.err (!%p232_p9)
}
  0x18   :  { %s266_s19 = smov 64   ;;  %s267_s20 = smov 4  }
  0x19   :  { %33 = dma.hbm_to_vmem [thread:$0]  %s298_s1, 128, %s28_s17, [#allocation6], %s266_s19, %s266_s19, %s267_s20  }
  0x1a   :  { %256 = dma.done.wait [#allocation3], 256  }
  0x1b   :  { %257 = vsyncadd [#allocation3], 4294967040 }
  0x1c   :  { %258 = dma.done.wait [#allocation6], 128  }
  0x1d   :  { %259 = vsyncadd [#allocation6], 4294967168  ;;  %v40_v0 = vld [vmem:[#allocation2] sm:$0xff]  ;;  %v41_v1 = vld [vmem:[#allocation2 + $0x8] sm:$0xff]  ;;  %vm113_vm2 = vcmask 7168   ;;  %s268_s1 = smov [#allocation7]  }
  0x1e   :  { %v46_v2 = vand.u32 2147483647, %v40_v0  ;;  %v47_v3 = vand.u32 2147483647, %v41_v1  ;;  %v166_v12 = vld [vmem:[#allocation5] sm:$0xff]   ;;  %vm58_vm0 = vcmp.ge.f32.partialorder %v40_v0, 0.0 }
  0x1f   :  { %v167_v13 = vunpack.c.l.bf16 %v166_v12  ;;  %v168_v14 = vunpack.c.h.bf16 %v166_v12  ;;  %vm59_vm1 = vcmp.ge.f32.partialorder %v41_v1, 0.0  ;;  %v64_v16 = vmax.f32 %v40_v0, 0.0  ;;  %s155_s23 = sshll.u32 %s268_s1, 4  ;;  %s156_s23 = int_to_ptr.vmem [resolvable:$true] %s155_s23 }
  0x20   :  { %v48_v4 = vsub.f32 0.0, %v46_v2  ;;  %v49_v5 = vsub.f32 0.0, %v47_v3  ;;  %v65_v20 = vmax.f32 %v41_v1, 0.0  ;;  %s236_s25 = scalar_lea.vmem %s156_s23, 16  ;;  %s240_s26 = scalar_lea.vmem %s156_s23, 32 }
  0x21   :  { %v66_v19 = vmul.f32 %v167_v13, %v40_v0  ;;  %v67_v21 = vmul.f32 %v168_v14, %v41_v1  ;;  %p237_p10 = scmp.ne.s32.totalorder %s156_s23, %s236_s25  ;;  %p241_p11 = scmp.lt.s32.totalorder %s156_s23, %s156_s23 }
  0x22   :  { %v50_v6 = vmul.f32 1.442695, %v48_v4  ;;  %v52_v7 = vmul.f32 1.442695, %v49_v5  ;;  %p242_p12 = scmp.lt.s32.totalorder %s240_s26, %s236_s25 }
  0x23   :  { %v68_v29 = vsub.f32 %v64_v16, %v66_v19  ;;  %v69_v30 = vsub.f32 %v65_v20, %v67_v21 }
  0x24   :  { %180 = vpow2.f32 %v50_v6  ;;  %p243_p13 = por %p242_p12, %p241_p11 }
  0x25   :  { %182 = vpow2.f32 %v52_v7 }
  0x26   :  { %p244_p0 = pnand %p243_p13, %p237_p10 }
  0x31   :  { %v181_v8 = vpop.eup %180 }
  0x32   :  { %v183_v9 = vpop.eup %182  ;;  %v54_v10 = vadd.f32 1.0, %v181_v8 }
  0x33   :  { %v55_v11 = vadd.f32 1.0, %v183_v9 }
  0x34   :  { %184 = vrcp.f32 %v54_v10 }
  0x35   :  { %186 = vrcp.f32 %v55_v11 }
  0x36   :  { %188 = vlog2.f32 %v54_v10 }
  0x37   :  { %190 = vlog2.f32 %v55_v11 }
  0x41   :  { %v185_v15 = vpop.eup %184 }
  0x42   :  { %v187_v17 = vpop.eup %186  ;;  %v60_v18 = vmul.f32 %v185_v15, %v181_v8 }
  0x43   :  { %v189_v22 = vpop.eup %188  ;;  %v61_v23 = vmul.f32 %v187_v17, %v183_v9  ;;  %v140_v9 = vlaneseq }
  0x44   :  { %v191_v24 = vpop.eup %190  ;;  %v62_v25 = vsel %vm58_vm0, %v185_v15, %v60_v18  ;;  %v71_v33 = vmul.f32 0.6931472, %v189_v22 }
  0x45   :  { %v86_v26 = vadd.f32 %v167_v13, %v62_v25  ;;  %v63_v27 = vsel %vm59_vm1, %v187_v17, %v61_v23  ;;  %v80_v28 = vmul.f32 %v167_v13, %v62_v25  ;;  %v73_v34 = vmul.f32 0.6931472, %v191_v24 }
  0x46   :  { %v87_v31 = vadd.f32 %v168_v14, %v63_v27  ;;  %v81_v32 = vmul.f32 %v168_v14, %v63_v27  ;;  %v74_v35 = vadd.f32 %v71_v33, %v68_v29  ;;  %v141_v10 = vand.u32 127, %v140_v9 }
  0x47   :  { %88 = vadd.xlane.f32.xlu0 %v86_v26  ;;  %82 = vadd.xlane.f32.xlu1 %v80_v28  ;;  %v75_v36 = vadd.f32 %v73_v34, %v69_v30 }
  0x48   :  { %vm143_vm3 = vcmp.eq.s32.totalorder %v141_v10, 1  ;;  %vm142_vm4 = vcmp.eq.s32.totalorder %v141_v10, 0 }
  0x4b   :  { %90 = vadd.xlane.f32.xlu0 %v87_v31  ;;  %84 = vadd.xlane.f32.xlu1 %v81_v32 }
  0x4f   :  { %76 = vadd.xlane.f32.xlu0 %v74_v35  ;;  %78 = vadd.xlane.f32.xlu1 %v75_v36 }
  0xd0   :  { %v89_v37 = vpop.xlane.xlu0 %88  ;;  %v83_v38 = vpop.xlane.xlu1 %82 }
  0xd1   :  { %v96_v39 = vadd.f32 1.0, %v89_v37  ;;  %v92_v48 = vmul.f32 2.0, %v83_v38 }
  0xd3   :  { %192 = vrcp.f32 %v96_v39  ;;  %v94_v50 = vadd.f32 1.0, %v92_v48 }
  0xd4   :  { %v91_v40 = vpop.xlane.xlu0 %90  ;;  %v85_v41 = vpop.xlane.xlu1 %84 }
  0xd5   :  { %v97_v42 = vadd.f32 1.0, %v91_v40  ;;  %v93_v49 = vmul.f32 2.0, %v85_v41 }
  0xd7   :  { %194 = vrcp.f32 %v97_v42  ;;  %v95_v52 = vadd.f32 1.0, %v93_v49 }
  0xd8   :  { %v77_v43 = vpop.xlane.xlu0 %76  ;;  %v79_v44 = vpop.xlane.xlu1 %78 }
  0xd9   :  { %v114_v45 = vsel %vm113_vm2, %v77_v43, 0.0  ;;  %v115_v46 = vsel %vm113_vm2, %v79_v44, 0.0 }
  0xda   :  { %v116_v47 = vadd.f32 %v115_v46, %v114_v45 }
  0xdc   :  { %117 = vadd.xlane.f32.xlu0 %v116_v47 }
  0xe0   :  { %v193_v51 = vpop.eup %192 }
  0xe1   :  { %v99_v53 = vmul.f32 %v193_v51, %v94_v50 }
  0xe3   :  { %v128_v56 = vsel %vm113_vm2, %v99_v53, 0.0 }
  0xe4   :  { %v195_v54 = vpop.eup %194 }
  0xe5   :  { %v101_v55 = vmul.f32 %v195_v54, %v95_v52 }
  0xe7   :  { %v129_v57 = vsel %vm113_vm2, %v101_v55, 0.0 }
  0xe8   :  { %v130_v58 = vadd.f32 %v129_v57, %v128_v56 }
  0xea   :  { %131 = vadd.xlane.f32.xlu1 %v130_v58 }
 0x165   :  { %v118_v59 = vpop.xlane.xlu0 %117 }
 0x166   :  { %v119_v60 = vrot.slane %v118_v59, 4 }
 0x168   :  { %v120_v61 = vadd.f32 %v119_v60, %v118_v59 }
 0x16a   :  { %v121_v62 = vrot.slane %v120_v61, 2 }
 0x16c   :  { %v122_v63 = vadd.f32 %v121_v62, %v120_v61 }
 0x16e   :  { %v123_v0 = vrot.slane %v122_v63, 1 }
 0x170   :  { %v124_v1 = vadd.f32 %v123_v0, %v122_v63 }
 0x172   :  { %169 = vpush %v124_v1 }
 0x173   :  { %v132_v2 = vpop.xlane.xlu1 %131 }
 0x174   :  { %v133_v3 = vrot.slane %v132_v2, 4 }
 0x176   :  { %v134_v4 = vadd.f32 %v133_v3, %v132_v2 }
 0x178   :  { %v135_v5 = vrot.slane %v134_v4, 2 }
 0x17a   :  { %v136_v6 = vadd.f32 %v135_v5, %v134_v4 }
 0x17c   :  { %v137_v7 = vrot.slane %v136_v6, 1 }
 0x17e   :  { %v138_v8 = vadd.f32 %v137_v7, %v136_v6 }
 0x180   :  { %171 = vpush %v138_v8 }
 0x1a3   :  { %s170_s0 = spop %169 }
 0x1a4   :  { %v146_v12 = vstv %s170_s0 }
 0x1b1   :  { %s172_s24 = spop %171 }
 0x1b2   :  { %v144_v11 = vstv %s172_s24 }
 0x1b3   :  { %v145_v13 = vsel %vm143_vm3, %v144_v11, 0.0 }
 0x1b4   :  { %v147_v14 = vsel %vm142_vm4, %v146_v12, %v145_v13 }
 0x1b5   :  { %148 = vst [vmem:[#allocation7] sm:$0x1] %v147_v14 }
 0x1b6   :  { %247 = shalt.err (!%p244_p0)
}
 0x1b7   :  { %158 = dma.vmem_to_hbm [thread:$0]  %s156_s23, 16, %s299_s2, [#allocation4]  }
 0x1b8   :  { %260 = dma.done.wait [#allocation4], 16  }
 0x1b9   :  { %261 = vsyncadd [#allocation4], 4294967280 }
 0x1ba   :  { %162 = vsyncpa [#allocation3], 1 }
 0x1bb   :  { %163 = vsyncpa [#allocation6], 1 }
 0x1bc   :  { %164 = vsyncpa [#allocation4], 1 }

</bundles_post_ra>
